<compile_context>
chip_gen: v7x
topology: tpu7x:2x2x1
jax: 0.10.0
libtpu: 0.0.40
codegen_flags: <defaults>
</compile_context>

<pallas_src>
import functools

import jax
import jax.numpy as jnp
import numpy as np
from jax.experimental import pallas as pl
from jax.experimental.pallas import tpu as pltpu

_NEG_BIG = -1e30  # finite "-inf" so the online softmax never produces exp(inf-inf)=NaN


def _pick_tile(n, preferred):
    """Largest aligned tile: `preferred` if it divides n, else the full dim."""
    return preferred if (n % preferred == 0) else n


# ---------------------------------------------------------------------------
# Head-batched linear projection:  out = x @ w + b   (x:(M,K), w:(K,N), b:(N,))
# ---------------------------------------------------------------------------
def _proj_kernel(x_ref, w_ref, b_ref, o_ref, acc_ref):
    k = pl.program_id(2)

    @pl.when(k == 0)
    def _():
        acc_ref[...] = jnp.zeros_like(acc_ref)

    acc_ref[...] += jnp.dot(x_ref[...], w_ref[...],
                            preferred_element_type=jnp.float32)

    @pl.when(k == pl.num_programs(2) - 1)
    def _():
        o_ref[...] = (acc_ref[...] + b_ref[...].astype(jnp.float32)).astype(o_ref.dtype)


def linear_projection(x, w, b, *, tile_m=128, tile_n=128, tile_k=128):
    M, K = x.shape
    K2, N = w.shape
    assert K == K2 and b.shape == (N,)
    tm = _pick_tile(M, tile_m)
    tn = _pick_tile(N, tile_n)
    tk = _pick_tile(K, tile_k)
    b2 = b.reshape(1, N)

    return pl.pallas_call(
        _proj_kernel,
        out_shape=jax.ShapeDtypeStruct((M, N), x.dtype),
        grid_spec=pltpu.PrefetchScalarGridSpec(
            num_scalar_prefetch=0,
            grid=(M // tm, N // tn, K // tk),
            in_specs=[
                pl.BlockSpec((tm, tk), lambda i, j, k: (i, k)),
                pl.BlockSpec((tk, tn), lambda i, j, k: (k, j)),
                pl.BlockSpec((1, tn), lambda i, j, k: (0, j)),
            ],
            out_specs=pl.BlockSpec((tm, tn), lambda i, j, k: (i, j)),
            scratch_shapes=[pltpu.VMEM((tm, tn), jnp.float32)],
        ),
        compiler_params=pltpu.CompilerParams(
            dimension_semantics=("parallel", "parallel", "arbitrary")),
    )(x, w, b2)


# ---------------------------------------------------------------------------
# Flash-style multi-head attention over head-concatenated q/k/v projections.
#   qp, kp : (seq, H*dim_key)   vp : (seq, H*dim_value)
#   out    : (seq, H*dim_value)  == torch.cat(heads, dim=1)
# ---------------------------------------------------------------------------
def _flash_kernel(q_ref, k_ref, v_ref, o_ref, m_sc, l_sc, acc_sc,
                  *, scale, masked, tile_q, tile_kv):
    kv = pl.program_id(2)

    @pl.when(kv == 0)
    def _():
        m_sc[...] = jnp.full_like(m_sc, _NEG_BIG)
        l_sc[...] = jnp.zeros_like(l_sc)
        acc_sc[...] = jnp.zeros_like(acc_sc)

    # Fold 1/dim_model into the small (tq, d) Q tile, then contract on the feature
    # axis so K is consumed untransposed by the MXU; accumulate in f32.
    q = q_ref[...] * jnp.asarray(scale, dtype=q_ref.dtype)
    s = jax.lax.dot_general(
        q, k_ref[...],
        dimension_numbers=(((1,), (1,)), ((), ())),
        preferred_element_type=jnp.float32)                     # (tile_q, tile_kv)

    if masked:  # causal mask, equivalent to the tril-based mask of the reference
        row = pl.program_id(1) * tile_q + jax.lax.broadcasted_iota(
            jnp.int32, (tile_q, tile_kv), 0)
        col = kv * tile_kv + jax.lax.broadcasted_iota(
            jnp.int32, (tile_q, tile_kv), 1)
        s = jnp.where(col > row, _NEG_BIG, s)

    # Online softmax update.
    m_prev = m_sc[...]
    m_new = jnp.maximum(m_prev, jnp.max(s, axis=-1, keepdims=True))
    alpha = jnp.exp(m_prev - m_new)                              # EUP
    p = jnp.exp(s - m_new)                                       # EUP
    l_sc[...] = alpha * l_sc[...] + jnp.sum(p, axis=-1, keepdims=True)
    acc_sc[...] = alpha * acc_sc[...] + jax.lax.dot_general(
        p.astype(v_ref.dtype), v_ref[...],
        dimension_numbers=(((1,), (0,)), ((), ())),
        preferred_element_type=jnp.float32)
    m_sc[...] = m_new

    @pl.when(kv == pl.num_programs(2) - 1)
    def _():
        inv_l = pl.reciprocal(l_sc[...], approx=True)            # EUP, ~free
        o_ref[...] = (acc_sc[...] * inv_l).astype(o_ref.dtype)


def flash_mha(qp, kp, vp, *, nb_heads, dim_key, dim_value, dim_model,
              masked=False, tile_q=128, tile_kv=128):
    seq = qp.shape[0]
    assert qp.shape == (seq, nb_heads * dim_key)
    assert kp.shape == (seq, nb_heads * dim_key)
    assert vp.shape == (seq, nb_heads * dim_value)
    tq = _pick_tile(seq, tile_q)
    tkv = _pick_tile(seq, tile_kv)

    kernel = functools.partial(
        _flash_kernel, scale=1.0 / float(dim_model), masked=masked,
        tile_q=tq, tile_kv=tkv)

    return pl.pallas_call(
        kernel,
        out_shape=jax.ShapeDtypeStruct((seq, nb_heads * dim_value), qp.dtype),
        grid_spec=pltpu.PrefetchScalarGridSpec(
            num_scalar_prefetch=0,
            grid=(nb_heads, seq // tq, seq // tkv),
            in_specs=[
                pl.BlockSpec((tq, dim_key), lambda h, i, k: (i, h)),
                pl.BlockSpec((tkv, dim_key), lambda h, i, k: (k, h)),
                pl.BlockSpec((tkv, dim_value), lambda h, i, k: (k, h)),
            ],
            # Lane-dense write straight into the concatenated output buffer.
            out_specs=pl.BlockSpec((tq, dim_value), lambda h, i, k: (i, h)),
            scratch_shapes=[
                pltpu.VMEM((tq, 1), jnp.float32),          # running max m
                pltpu.VMEM((tq, 1), jnp.float32),          # running sum l
                pltpu.VMEM((tq, dim_value), jnp.float32),  # output accumulator
            ],
        ),
        compiler_params=pltpu.CompilerParams(
            dimension_semantics=("parallel", "parallel", "arbitrary")),
    )(qp, kp, vp)


def multi_head_attention(Q, K, V, params, *, nb_heads, dim_key, dim_value,
                         masked=False):
    """Q, K, V: (seq, dim_model), dim_model = nb_heads*dim_key.
    params: head-concatenated weights wq/wk:(dim_model,H*dk), wv:(dim_model,H*dv),
            biases bq/bk:(H*dk,), bv:(H*dv,)."""
    dim_model = nb_heads * dim_key
    qp = linear_projection(Q, params["wq"], params["bq"])
    kp = linear_projection(K, params["wk"], params["bk"])
    vp = linear_projection(V, params["wv"], params["bv"])
    return flash_mha(qp, kp, vp, nb_heads=nb_heads, dim_key=dim_key,
                     dim_value=dim_value, dim_model=dim_model, masked=masked)


# ---------------------------------------------------------------------------
# Pure-JAX reference (mirrors the PyTorch module) for validation.
# ---------------------------------------------------------------------------
def mha_reference(Q, K, V, params, *, nb_heads, dim_key, dim_value, dim_model,
                  masked=False):
    qp = Q @ params["wq"] + params["bq"]
    kp = K @ params["wk"] + params["bk"]
    vp = V @ params["wv"] + params["bv"]
    heads = []
    for h in range(nb_heads):
        qh = qp[:, h * dim_key:(h + 1) * dim_key]
        kh = kp[:, h * dim_key:(h + 1) * dim_key]
        vh = vp[:, h * dim_value:(h + 1) * dim_value]
        s = (qh @ kh.T) / dim_model
        if masked:
            n = s.shape[0]
            row = jnp.arange(n)[:, None]
            col = jnp.arange(n)[None, :]
            s = jnp.where(col > row, -jnp.inf, s)
        p = jax.nn.softmax(s, axis=-1)   # nn.Softmax() on 2-D -> dim=1
        heads.append(p @ vh)
    return jnp.concatenate(heads, axis=1)


if __name__ == "__main__":
    # Small but TPU-aligned shapes: per-head dims of 128 keep every BlockSpec
    # (8,128)-legal and stores lane-dense.
    nb_heads = 2
    dim_key = 128
    dim_value = 128
    dim_model = nb_heads * dim_key          # 256
    seq = 256
    dtype = jnp.float32                     # bf16 inputs also supported by the kernels

    root = jax.random.PRNGKey(0)
    ks = jax.random.split(root, 9)
    w_scale = 1.0 / np.sqrt(dim_model)
    Q = jax.random.normal(ks[0], (seq, dim_model), dtype)
    K = jax.random.normal(ks[1], (seq, dim_model), dtype)
    V = jax.random.normal(ks[2], (seq, dim_model), dtype)
    params = {
        "wq": jax.random.normal(ks[3], (dim_model, nb_heads * dim_key), dtype) * w_scale,
        "wk": jax.random.normal(ks[4], (dim_model, nb_heads * dim_key), dtype) * w_scale,
        "wv": jax.random.normal(ks[5], (dim_model, nb_heads * dim_value), dtype) * w_scale,
        "bq": jax.random.normal(ks[6], (nb_heads * dim_key,), dtype) * 0.1,
        "bk": jax.random.normal(ks[7], (nb_heads * dim_key,), dtype) * 0.1,
        "bv": jax.random.normal(ks[8], (nb_heads * dim_value,), dtype) * 0.1,
    }

    out = multi_head_attention(Q, K, V, params, nb_heads=nb_heads,
                               dim_key=dim_key, dim_value=dim_value, masked=False)
    out = jax.block_until_ready(out)

    ref = mha_reference(Q, K, V, params, nb_heads=nb_heads, dim_key=dim_key,
                        dim_value=dim_value, dim_model=dim_model, masked=False)
    np.testing.assert_allclose(np.asarray(out), np.asarray(ref), rtol=2e-2, atol=2e-2)

    print("KERNEL_OK")
</pallas_src>

<mosaic_0001>
module attributes {stable_mosaic.version = 11 : i64} {
  func.func @_proj_kernel(%arg0: i32, %arg1: i32, %arg2: i32, %arg3: memref<128x128xf32, #tpu.memory_space<vmem>>, %arg4: memref<128x128xf32, #tpu.memory_space<vmem>>, %arg5: memref<1x128xf32, #tpu.memory_space<vmem>>, %arg6: memref<128x128xf32, #tpu.memory_space<vmem>>, %arg7: memref<128x128xf32, #tpu.memory_space<vmem>>) attributes {dimension_semantics = [#tpu.dimension_semantics<parallel>, #tpu.dimension_semantics<parallel>, #tpu.dimension_semantics<arbitrary>], iteration_bounds = array<i64: 2, 2, 2>, scalar_prefetch = 0 : i64, scratch_operands = 1 : i64, tpu.core_type = #tpu.core_type<tc>, window_params = [{transform_indices = @transform_0, window_bounds = array<i64: 128, 128>}, {transform_indices = @transform_1, window_bounds = array<i64: 128, 128>}, {transform_indices = @transform_2, window_bounds = array<i64: 1, 128>}, {transform_indices = @transform_3, window_bounds = array<i64: 128, 128>}]} {
    %c0_i32 = arith.constant 0 : i32
    %0 = arith.cmpi eq, %arg2, %c0_i32 : i32
    %1 = arith.extui %0 : i1 to i32
    %c0_i32_0 = arith.constant 0 : i32
    %2 = arith.cmpi ne, %1, %c0_i32_0 : i32
    scf.if %2 {
      %cst_9 = arith.constant 0.000000e+00 : f32
      %12 = vector.broadcast %cst_9 : f32 to vector<128x128xf32>
      %c0_10 = arith.constant 0 : index
      %c0_11 = arith.constant 0 : index
      %13 = vector.load %arg7[%c0_10, %c0_11] : memref<128x128xf32, #tpu.memory_space<vmem>>, vector<128x128xf32>
      tpu.vector_store %arg7[%c0_10, %c0_11], %12 {strides = array<i32>} : memref<128x128xf32, #tpu.memory_space<vmem>>, vector<128x128xf32>,
    } else {
    }
    %c0 = arith.constant 0 : index
    %c0_1 = arith.constant 0 : index
    %3 = vector.load %arg7[%c0, %c0_1] : memref<128x128xf32, #tpu.memory_space<vmem>>, vector<128x128xf32>
    %c0_2 = arith.constant 0 : index
    %c0_3 = arith.constant 0 : index
    %4 = vector.load %arg3[%c0_2, %c0_3] : memref<128x128xf32, #tpu.memory_space<vmem>>, vector<128x128xf32>
    %c0_4 = arith.constant 0 : index
    %c0_5 = arith.constant 0 : index
    %5 = vector.load %arg4[%c0_4, %c0_5] : memref<128x128xf32, #tpu.memory_space<vmem>>, vector<128x128xf32>
    %cst = arith.constant dense<0.000000e+00> : vector<128x128xf32>
    %6 = tpu.matmul %4, %5, %cst {dimension_numbers = #tpu.dot_dimension_numbers<[1], [0], [0], [1], [0, 0, 1, 1], [], []>} : vector<128x128xf32>, vector<128x128xf32>, vector<128x128xf32> -> vector<128x128xf32>
    %7 = arith.addf %3, %6 : vector<128x128xf32>
    %c0_6 = arith.constant 0 : index
    %c0_7 = arith.constant 0 : index
    %8 = vector.load %arg7[%c0_6, %c0_7] : memref<128x128xf32, #tpu.memory_space<vmem>>, vector<128x128xf32>
    tpu.vector_store %arg7[%c0_6, %c0_7], %7 {strides = array<i32>} : memref<128x128xf32, #tpu.memory_space<vmem>>, vector<128x128xf32>,
    %c1_i32 = arith.constant 1 : i32
    %9 = arith.cmpi eq, %arg2, %c1_i32 : i32
    %10 = arith.extui %9 : i1 to i32
    %c0_i32_8 = arith.constant 0 : i32
    %11 = arith.cmpi ne, %10, %c0_i32_8 : i32
    scf.if %11 {
      %c0_9 = arith.constant 0 : index
      %c0_10 = arith.constant 0 : index
      %12 = vector.load %arg7[%c0_9, %c0_10] : memref<128x128xf32, #tpu.memory_space<vmem>>, vector<128x128xf32>
      %c0_11 = arith.constant 0 : index
      %c0_12 = arith.constant 0 : index
      %13 = vector.load %arg5[%c0_11, %c0_12] : memref<1x128xf32, #tpu.memory_space<vmem>>, vector<1x128xf32>
      %14 = vector.broadcast %13 : vector<1x128xf32> to vector<128x128xf32>
      %15 = arith.addf %12, %14 : vector<128x128xf32>
      %c0_13 = arith.constant 0 : index
      %c0_14 = arith.constant 0 : index
      %16 = vector.load %arg6[%c0_13, %c0_14] : memref<128x128xf32, #tpu.memory_space<vmem>>, vector<128x128xf32>
      tpu.vector_store %arg6[%c0_13, %c0_14], %15 {strides = array<i32>} : memref<128x128xf32, #tpu.memory_space<vmem>>, vector<128x128xf32>,
    } else {
    }
    return
  }
  func.func @transform_0(%arg0: i32, %arg1: i32, %arg2: i32) -> (i32, i32) {
    %c0_i32 = arith.constant 0 : i32
    return %arg0, %arg2 : i32, i32
  }
  func.func @transform_1(%arg0: i32, %arg1: i32, %arg2: i32) -> (i32, i32) {
    %c0_i32 = arith.constant 0 : i32
    return %arg2, %arg1 : i32, i32
  }
  func.func @transform_2(%arg0: i32, %arg1: i32, %arg2: i32) -> (i32, i32) {
    %c0_i32 = arith.constant 0 : i32
    %c0_i32_0 = arith.constant 0 : i32
    return %c0_i32, %arg1 : i32, i32
  }
  func.func @transform_3(%arg0: i32, %arg1: i32, %arg2: i32) -> (i32, i32) {
    %c0_i32 = arith.constant 0 : i32
    return %arg0, %arg1 : i32, i32
  }
}

</mosaic_0001>

<bundles_post_ra>
// kernel: tpu_custom_call.1
= control target key start
LH: loop header
LB: loop body
LE: loop exit
PB: predicated region body
PF: predicated region fallthrough
CT: control target
= control target key end

     0   :  { %s1756_s0 = inlined_call_operand.hbm [shape: f32[256,256], index: 0, kind: input, shape index: {}]   ;;  %s1757_s1 = inlined_call_operand.hbm [shape: f32[256,256], index: 1, kind: input, shape index: {}]   ;;  %s1758_s2 = inlined_call_operand.vmem [shape: f32[1,256], index: 2, kind: input, shape index: {}]   ;;  %s1759_s3 = inlined_call_operand.hbm [shape: f32[256,256], index: 3, kind: output, shape index: {}]  }
   0x1   :  { %1777 = sst [smem:[#allocation19_spill]] %s1756_s0 }
   0x2   :  { %1778 = sst [smem:[#allocation20_spill]] %s1757_s1 }
   0x3   :  { %1779 = sst [smem:[#allocation21_spill]] %s1759_s3 }
   0x4   :  { %8 = vsyncpa [#allocation4], 0 }
   0x5   :  { %10 = vsyncpa [#allocation4 + $0x1], 0 }
   0x6   :  { %11 = vsyncpa [#allocation7], 0 }
   0x7   :  { %13 = vsyncpa [#allocation7 + $0x1], 0 }
   0x8   :  { %14 = vsyncpa [#allocation5], 0 }
   0x9   :  { %16 = vsyncpa [#allocation5 + $0x1], 0  ;;  %s1299_s12 = smov 0   ;;  %s1301_s13 = smov 0  }
   0xa   :  { %s1303_s14 = smov 0   ;;  %s1305_s15 = smov 0  }
   0xb   :  { %s1307_s16 = smov 0   ;;  %s1309_s17 = smov 0  }
   0xc   :  { %s1311_s18 = smov 0   ;;  %s1313_s19 = smov 0  }
   0xd   :  { %s1315_s20 = smov 0   ;;  %s1317_s21 = smov 0  }
   0xe   :  { %s1319_s22 = smov 0   ;;  %s1321_s23 = smov 0  }
   0xf   :  { %s1323_s24 = smov 0   ;;  %s1325_s25 = smov 0  }
  0x10   :  { %s1327_s26 = smov 0   ;;  %s1329_s27 = smov 0  }
  0x11 LB: > { %1780 = sst [smem:[#allocation12_spill]] %s1243_s21  ;;  %s34_s28 = sadd.s32 1, %s1255_s24  ;;  %s1267_s27 = sphi %s1329_s27, %s22_s27   ;;  %s1263_s26 = sphi %s1327_s26, %s1821_s26   ;;  %s1259_s25 = sphi %s1325_s25, %s1834_s25   ;;  %s1255_s24 = sphi %s1323_s24, %s1833_s24   ;;  %s1251_s23 = sphi %s1321_s23, %s1818_s23   ;;  %s1247_s22 = sphi %s1319_s22, %s1832_s22   ;;  %s1243_s21 = sphi %s1317_s21, %s1831_s21   ;;  %s1239_s20 = sphi %s1315_s20, %s1830_s20   ;;  %s1235_s19 = sphi %s1313_s19, %s1829_s19   ;;  %s1231_s18 = sphi %s1311_s18, %s1828_s18   ;;  %s1227_s17 = sphi %s1309_s17, %s1827_s17   ;;  %s1223_s16 = sphi %s1307_s16, %s1826_s16   ;;  %s1219_s15 = sphi %s1305_s15, %s1825_s15   ;;  %s1215_s14 = sphi %s1303_s14, %s1824_s14   ;;  %s1211_s13 = sphi %s1301_s13, %s1823_s13   ;;  %s1207_s12 = sphi %s1299_s12, %s1822_s12  }
  0x12   : > { %1781 = sst [smem:[#allocation13_spill]] %s1251_s23  ;;  %s1760_s29 = sadd.s32 4294967295, %s1267_s27  }
  0x13   : > { %1782 = sst [smem:[#allocation14_spill]] %s1263_s26  ;;  %p1379_p0 = scmp.ge.s32.totalorder %s34_s28, 2 }
  0x14   : > { %p57_p1 = scmp.ne.s32.totalorder %s1239_s20, %s1235_s19  ;;  %p1764_p2 = scmp.eq.s32.totalorder %s1267_s27, 0 }
  0x15   : > { %s1836_s28 = smov (%p1379_p0, %s34_s28), 0  ;;  %p63_p3 = scmp.ne.s32.totalorder %s1235_s19, %s1231_s18 }
  0x16   : > { %1784 = sst [smem:[#allocation15_spill]] %s1836_s28  ;;  %p1395_p4 = scmp.eq.s32.totalorder %s1760_s29, 0 }
  0x17   : > { %s1401_s7 = ssub.s32 %s1255_s24, %s1836_s28  ;;  %p59_p5 = por %p1764_p2, %p57_p1 }
  0x18   : > { %s1785_s6 = scalar_select %p1395_p4, 1, 0 }
  0x19   : > { %p1407_p6 = por %p1395_p4, %p63_p3  ;;  %p1763_p7 = scmp.lt.s32.totalorder %s1267_s27, 8 }
  0x1a   : > { %s169_s9 = sand.u32 1, %s1239_s20   ;;  %s748_s11 = sshll.u32 %s1263_s26, 5 }
  0x1b   : > { %s1786_s8 = scalar_select %p1407_p6, 1, 0 }
  0x1c   : > { %s727_s10 = sshll.u32 %s169_s9, 7  ;;  %s179_s18 = sadd.s32 %s1255_s24, %s748_s11 }
  0x1d   : > { %s173_s5 = scalar_lea.vmem [#allocation3], %s727_s10  ;;  %s730_s29 = sshll.u32 %s179_s18, 7 }
  0x1e   : > { %s182_s4 = sshll.u32 %s173_s5, 4  ;;  %s1787_s0 = sld [smem:[#allocation19_spill]]  ;;  %s1415_s4 = int_to_ptr.vmem [resolvable:$true] %s182_s4 }
  0x1f   : > { %p1424_p8 = pnand %p1763_p7, %p59_p5  ;;  %s1428_s5 = scalar_lea.sflag [#allocation4], %s169_s9 }
  0x21   : > { %p1043_p10 = pneg %p1424_p8 }
  0x24   : > { %s1420_s23 = scalar_lea.hbm %s1787_s0, %s730_s29  ;;  %s1046_s29 = scalar_lea.hbm %s1787_s0, 8192 }
  0x25   : > { %s1041_s10 = scalar_lea.hbm %s1420_s23, 2048  ;;  %p1047_p13 = scmp.lt.u32.totalorder %s1420_s23, %s1787_s0 }
  0x26   : > { %p1042_p9 = scmp.ne.s32.totalorder %s1420_s23, %s1041_s10  ;;  %p1048_p1 = scmp.lt.u32.totalorder %s1046_s29, %s1041_s10 }
  0x27   : > { %p1050_p5 = scmp.lt.u32.totalorder %s1041_s10, %s1420_s23 }
  0x28   : > { %p1044_p11 = pnand %p1043_p10, %p1042_p9  ;;  %p1049_p3 = por %p1048_p1, %p1047_p13 }
  0x2a   : > { %p1045_p12 = pneg %p1044_p11  ;;  %p1051_p7 = por %p1050_p5, %p1049_p3 }
  0x2c   : > { %p1052_p2 = pnand %p1051_p7, %p1045_p12 }
  0x2e   : > { %1055 = shalt.err (!%p1052_p2)
}
  0x2f   : > { %s1056_s9 = scalar_lea.vmem %s1415_s4, 2048  ;;  %s1269_s3 = smov [#allocation3]  }
  0x30   : > { %p1057_p9 = scmp.ne.s32.totalorder %s1415_s4, %s1056_s9  ;;  %s1061_s28 = sshll.u32 %s1269_s3, 4  ;;  %s1062_s28 = int_to_ptr.vmem [resolvable:$false] %s1061_s28 }
  0x31   : > { %s1063_s11 = scalar_lea.vmem %s1062_s28, 4096  ;;  %p1064_p4 = scmp.lt.s32.totalorder %s1415_s4, %s1062_s28 }
  0x32   : > { %p1059_p11 = pnand %p1057_p9, %p1043_p10  ;;  %p1065_p13 = scmp.lt.s32.totalorder %s1063_s11, %s1056_s9 }
  0x34   : > { %p1060_p6 = pneg %p1059_p11  ;;  %p1066_p1 = por %p1065_p13, %p1064_p4 }
  0x36   : > { %p1067_p3 = pnand %p1066_p1, %p1060_p6 }
  0x38   : > { %1070 = shalt.err (!%p1067_p3)
}
  0x39   : > { %s1767_s10 = smov 256   ;;  %s1768_s29 = smov 128  }
  0x3a   : > { %s1769_s18 = smov 8   ;;  %p735_p2 = scmp.ge.s32.totalorder %s1267_s27, 1 }
  0x3b   : > { %896 = dma.hbm_to_vmem [thread:$0]  (!%p1424_p8), %s1420_s23, 2048, %s1415_s4, %s1428_s5, %s1767_s10, %s1768_s29, %s1769_s18  }
  0x3c   : > { %p219_p4 = scmp.lt.s32.totalorder %s1267_s27, 9  ;;  %s1789_s9 = sadd.s32 4294967295, %s1267_s27  }
  0x3d   : > { %p1463_p6 = scmp.eq.s32.totalorder %s1789_s9, 7  ;;  %s724_s21 = sadd.s32 4294967294, %s1267_s27  }
  0x3e   : > { %p1467_p7 = pnand %p735_p2, %p219_p4  ;;  %s37_s11 = sadd.s32 1, %s1259_s25 }
  0x3f   : > { %s1838_s11 = smov (!%p1379_p0, %s37_s11), %s1259_s25  ;;  %s78_s23 = sadd.s32 1, %s1227_s17 }
  0x40   : > { %p91_p8 = scmp.ne.s32.totalorder %s1223_s16, %s1219_s15  ;;  %p39_p10 = scmp.ge.s32.totalorder %s1838_s11, 2 }
  0x41   : > { %p85_p12 = scmp.ne.s32.totalorder %s1227_s17, %s1223_s16  ;;  %p1792_p5 = scmp.ne.s32.totalorder %s1785_s6, 0 }
  0x42   : > { %s132_s5 = sadd.s32 1, %s1215_s14  ;;  %s1840_s11 = smov (%p39_p10, %s1838_s11), 0 }
  0x43   : > { %p1483_p9 = por %p91_p8, %p1792_p5  ;;  %1794 = sst [smem:[#allocation16_spill]] %s1840_s11 }
  0x44   : > { %s1795_s9 = sadd.s32 1, %s1263_s26  ;;  %s74_s30 = ssub.s32 %s1259_s25, %s1840_s11 }
  0x45   : > { %s1793_s4 = scalar_select %p1483_p9, 1, 0 }
  0x46   : > { %s1842_s9 = smov (!%p39_p10, %s1795_s9), %s1263_s26  ;;  %p142_p0 = scmp.ne.s32.totalorder %s1215_s14, %s1211_s13 }
  0x47   : > { %p43_p11 = scmp.ge.s32.totalorder %s1842_s9, 2  ;;  %s75_s15 = sor.u32 %s74_s30, %s1401_s7 }
  0x48   : > { %p76_p13 = scmp.eq.s32.totalorder %s75_s15, 0  ;;  %p1500_p1 = por %p1463_p6, %p142_p0 }
  0x49   : > { %s1844_s9 = smov (%p43_p11, %s1842_s9), 0  ;;  %p148_p3 = scmp.ne.s32.totalorder %s1211_s13, %s1207_s12 }
  0x4a   : > { %s1796_s6 = scalar_select %p1500_p1, 1, 0 }
  0x4b   : > { %1798 = sst [smem:[#allocation18_spill]] %s1844_s9  ;;  %s45_s29 = ssub.s32 %s1263_s26, %s1844_s9 }
  0x4c   : > { %1797 = sst [smem:[#allocation17_spill]] %s1796_s6  ;;  %s47_s18 = sor.u32 %s1401_s7, %s45_s29 }
  0x4d   : > { %s1507_s10 = scalar_select %p76_p13, %s1227_s17, %s78_s23  }
  0x4e   : > { %s129_s0 = sor.u32 %s74_s30, %s45_s29  ;;  %p48_p2 = scmp.eq.s32.totalorder %s47_s18, 0 }
  0x4f   : > { %p130_p4 = scmp.eq.s32.totalorder %s129_s0, 0  ;;  %p149_p8 = scmp.eq.s32.totalorder %s724_s21, 7 }
  0x50   : > { %s192_s3 = sand.u32 1, %s1227_s17   ;;  %s1799_s15 = sadd.s32 1, %s1239_s20 }
  0x51   : > { %s1518_s11 = scalar_select %p48_p2, %s1239_s20, %s1799_s15  }
  0x52   : > { %s1521_s6 = scalar_select %p130_p4, %s1215_s14, %s132_s5  }
  0x53   : > { %p1800_p6 = scmp.eq.s32.totalorder %s1267_s27, 0  ;;  %p1528_p5 = por %p149_p8, %p148_p3 }
  0x54   : > { %s731_s9 = sshll.u32 %s192_s3, 7  ;;  %s749_s7 = sshll.u32 %s1255_s24, 5 }
  0x55   : > { %p87_p10 = por %p85_p12, %p1800_p6  ;;  %s202_s29 = sadd.s32 %s1259_s25, %s749_s7 }
  0x56   : > { %s1801_s23 = scalar_select %p1528_p5, 1, 0 }
  0x57   : > { %s734_s18 = sshll.u32 %s202_s29, 7  ;;  %s196_s30 = scalar_lea.vmem [#allocation6], %s731_s9 }
  0x58   : > { %s205_s0 = sshll.u32 %s196_s30, 4  ;;  %s1802_s1 = sld [smem:[#allocation20_spill]]  ;;  %s1539_s0 = int_to_ptr.vmem [resolvable:$true] %s205_s0 }
  0x59   : > { %p1803_p12 = scmp.lt.s32.totalorder %s1267_s27, 8  ;;  %s1547_s9 = scalar_lea.sflag [#allocation7], %s192_s3 }
  0x5b   : > { %p1543_p0 = pnand %p1803_p12, %p87_p10 }
  0x5d   : > { %p1073_p13 = pneg %p1543_p0 }
  0x5e   : > { %s1537_s15 = scalar_lea.hbm %s1802_s1, %s734_s18  ;;  %s1076_s18 = scalar_lea.hbm %s1802_s1, 8192 }
  0x5f   : > { %s1071_s7 = scalar_lea.hbm %s1537_s15, 2048  ;;  %p1077_p4 = scmp.lt.u32.totalorder %s1537_s15, %s1802_s1 }
  0x60   : > { %p1072_p11 = scmp.ne.s32.totalorder %s1537_s15, %s1071_s7  ;;  %p1078_p8 = scmp.lt.u32.totalorder %s1076_s18, %s1071_s7 }
  0x61   : > { %p1080_p10 = scmp.lt.u32.totalorder %s1071_s7, %s1537_s15 }
  0x62   : > { %p1074_p3 = pnand %p1073_p13, %p1072_p11  ;;  %p1079_p6 = por %p1078_p8, %p1077_p4 }
  0x64   : > { %p1075_p2 = pneg %p1074_p3  ;;  %p1081_p12 = por %p1080_p10, %p1079_p6 }
  0x66   : > { %p1082_p5 = pnand %p1081_p12, %p1075_p2 }
  0x68   : > { %1085 = shalt.err (!%p1082_p5)
}
  0x69   : > { %s1086_s3 = scalar_lea.vmem %s1539_s0, 2048  ;;  %s1273_s26 = smov [#allocation6]  }
  0x6a   : > { %p1087_p11 = scmp.ne.s32.totalorder %s1539_s0, %s1086_s3  ;;  %s1091_s29 = sshll.u32 %s1273_s26, 4  ;;  %s1092_s29 = int_to_ptr.vmem [resolvable:$false] %s1091_s29 }
  0x6b   : > { %s1093_s30 = scalar_lea.vmem %s1092_s29, 4096  ;;  %p1094_p9 = scmp.lt.s32.totalorder %s1539_s0, %s1092_s29 }
  0x6c   : > { %p1089_p3 = pnand %p1087_p11, %p1073_p13  ;;  %p1095_p4 = scmp.lt.s32.totalorder %s1093_s30, %s1086_s3 }
  0x6e   : > { %p1090_p1 = pneg %p1089_p3  ;;  %p1096_p8 = por %p1095_p4, %p1094_p9 }
  0x70   : > { %p1097_p6 = pnand %p1096_p8, %p1090_p1 }
  0x72   : > { %1100 = shalt.err (!%p1097_p6)
}
  0x73   : > { %s1805_s7 = smov 8   ;;  %s1806_s18 = smov 128  }
  0x74   : > { %s1807_s21 = smov 256   ;;  %223 = sbr.rel (%p1467_p7) target bundleno = 451 (0x1c3), region = 32 }
  0x75   : > { %899 = dma.hbm_to_vmem [thread:$0]  (!%p1543_p0), %s1537_s15, 2048, %s1539_s0, %s1547_s9, %s1807_s21, %s1806_s18, %s1805_s7  }
  0x76   : > { %s225_s26 = sand.u32 (!%p1467_p7), 1, %s1235_s19   ;;  %p1808_p9 = scmp.ne.s32.totalorder (!%p1467_p7), %s1786_s8, 0 }
  0x77   : > { %s736_s29 = sshll.u32 (!%p1467_p7), %s225_s26, 7  ;;  %s226_s3 = scalar_lea.sflag (!%p1467_p7), [#allocation4], %s225_s26 }
  0x78   : > { %s1581_s30 = scalar_lea.vmem (!%p1467_p7), [#allocation3], %s736_s29 }
  0x7b   : > { %1194 = dma.done.wait (%p1808_p9), %s226_s3, 2048  }
  0x7c   : > { %1196 = vsyncadd (%p1808_p9), %s226_s3, 4294965248  ;;  %s234_s5 = sand.u32 1, %s1223_s16   ;;  %p1809_p7 = scmp.ne.s32.totalorder %s1793_s4, 0 }
  0x7d   : > { %s737_s1 = sshll.u32 %s234_s5, 7  ;;  %s235_s0 = scalar_lea.sflag [#allocation7], %s234_s5 }
  0x7e   : > { %s1588_s15 = scalar_lea.vmem [#allocation6], %s737_s1 }
  0x7f   : > { %1198 = dma.done.wait (%p1809_p7), %s235_s0, 2048  }
  0x80   : > { %1200 = vsyncadd (%p1809_p7), %s235_s0, 4294965248  ;;  %s266_s28 = sand.u32 1, %s1211_s13   ;;  %p271_p1 = scmp.lt.s32.totalorder %s1247_s22, 1 }
  0x81   : > { %s738_s8 = sshll.u32 %s266_s28, 7  ;;  %s1810_s26 = sld [smem:[#allocation12_spill]] }
  0x82   : > { %s1599_s9 = scalar_select %p271_p1, %s1247_s22, 1 }
  0x83   : > { %s1605_s21 = scalar_lea.vmem [#allocation8], %s738_s8 }
  0x84   : > { %s273_s1 = scalar_lea.vmem %s1758_s2, %s1599_s9 }
  0x87   : > { %p739_p5 = scmp.ne.s32.totalorder %s1810_s26, 0 }
  0x88   : > { %v1274_v0 = vmov (!%p739_p5), 0.0  }
  0x89   : > { %278 = sbr.rel (%p739_p5) target bundleno = 145 (0x91), region = 44  ;;  %279 = vst [vmem:[#allocation2] sm:$0xff] (!%p739_p5), %v1274_v0  ;;  %280 = vst [vmem:[#allocation2 + $0x8] sm:$0xff] (!%p739_p5), %v1274_v0 }
  0x8a   : > { %281 = vst [vmem:[#allocation2 + $0x10] sm:$0xff] (!%p739_p5), %v1274_v0  ;;  %282 = vst [vmem:[#allocation2 + $0x18] sm:$0xff] (!%p739_p5), %v1274_v0 }
  0x8b   : > { %283 = vst [vmem:[#allocation2 + $0x20] sm:$0xff] (!%p739_p5), %v1274_v0  ;;  %284 = vst [vmem:[#allocation2 + $0x28] sm:$0xff] (!%p739_p5), %v1274_v0 }
  0x8c   : > { %285 = vst [vmem:[#allocation2 + $0x30] sm:$0xff] (!%p739_p5), %v1274_v0  ;;  %286 = vst [vmem:[#allocation2 + $0x38] sm:$0xff] (!%p739_p5), %v1274_v0 }
  0x8d   : > { %287 = vst [vmem:[#allocation2 + $0x40] sm:$0xff] (!%p739_p5), %v1274_v0  ;;  %288 = vst [vmem:[#allocation2 + $0x48] sm:$0xff] (!%p739_p5), %v1274_v0 }
  0x8e   : > { %289 = vst [vmem:[#allocation2 + $0x50] sm:$0xff] (!%p739_p5), %v1274_v0  ;;  %290 = vst [vmem:[#allocation2 + $0x58] sm:$0xff] (!%p739_p5), %v1274_v0 }
  0x8f   : > { %291 = vst [vmem:[#allocation2 + $0x60] sm:$0xff] (!%p739_p5), %v1274_v0  ;;  %292 = vst [vmem:[#allocation2 + $0x68] sm:$0xff] (!%p739_p5), %v1274_v0 }
  0x90   : > { %293 = vst [vmem:[#allocation2 + $0x70] sm:$0xff] %v1274_v0  ;;  %294 = vst [vmem:[#allocation2 + $0x78] sm:$0xff] %v1274_v0 }
  0x91 PF: > { %v327_v1 = vld [vmem:[%s1588_s15] sm:$0xff]  ;;  %v328_v2 = vld [vmem:[%s1588_s15 + $0x8] sm:$0xff]  ;;  %v329_v3 = vld [vmem:[%s1588_s15 + $0x10] sm:$0xff]  ;;  %s1811_s4 = sld [smem:[#allocation12_spill]] }
  0x92   : > { %v839_v4 = vpack.c.bf16 %v328_v2, %v327_v1  ;;  %v330_v5 = vld [vmem:[%s1588_s15 + $0x18] sm:$0xff]  ;;  %v331_v7 = vld [vmem:[%s1588_s15 + $0x20] sm:$0xff]  ;;  %v332_v8 = vld [vmem:[%s1588_s15 + $0x28] sm:$0xff] }
  0x93   : > { %v843_v6 = vpack.c.bf16 %v330_v5, %v329_v3  ;;  %v847_v9 = vpack.c.bf16 %v332_v8, %v331_v7  ;;  %v311_v10 = vld [vmem:[%s1581_s30] sm:$0xff]  ;;  %v333_v12 = vld [vmem:[%s1588_s15 + $0x30] sm:$0xff]  ;;  %v334_v13 = vld [vmem:[%s1588_s15 + $0x38] sm:$0xff] }
  0x94   : > { %840 = vmatprep.subr.bf16.mxu0 %v839_v4  ;;  %871 = vmatprep.subr.bf16.mxu1 %v839_v4  ;;  %v319_v11 = vld [vmem:[%s1581_s30 + $0x40] sm:$0xff]  ;;  %v851_v14 = vpack.c.bf16 %v334_v13, %v333_v12  ;;  %v336_v16 = vld [vmem:[%s1588_s15 + $0x48] sm:$0xff]  ;;  %v337_v18 = vld [vmem:[%s1588_s15 + $0x50] sm:$0xff] }
  0x95   : > { %842 = vmatpush3.bf16.msra.mxu0 %v839_v4  ;;  %879 = vmatpush3.bf16.msra.mxu1 %v839_v4  ;;  %v335_v15 = vld [vmem:[%s1588_s15 + $0x40] sm:$0xff]  ;;  %v338_v19 = vld [vmem:[%s1588_s15 + $0x58] sm:$0xff]  ;;  %v340_v22 = vld [vmem:[%s1588_s15 + $0x68] sm:$0xff] }
  0x96   : > { %844 = vmatprep.subr.bf16.mxu0 %v843_v6  ;;  %872 = vmatprep.subr.bf16.mxu1 %v843_v6  ;;  %v855_v17 = vpack.c.bf16 %v336_v16, %v335_v15  ;;  %v859_v20 = vpack.c.bf16 %v338_v19, %v337_v18  ;;  %v339_v21 = vld [vmem:[%s1588_s15 + $0x60] sm:$0xff]  ;;  %v341_v24 = vld [vmem:[%s1588_s15 + $0x70] sm:$0xff]  ;;  %v342_v25 = vld [vmem:[%s1588_s15 + $0x78] sm:$0xff] }
  0x97   : > { %815 = vmatprep.mubr.f32.mxu0 %v311_v10  ;;  %827 = vmatprep.mubr.f32.mxu1 %v319_v11  ;;  %v863_v23 = vpack.c.bf16 %v340_v22, %v339_v21  ;;  %v867_v26 = vpack.c.bf16 %v342_v25, %v341_v24  ;;  %v312_v27 = vld [vmem:[%s1581_s30 + $0x8] sm:$0xff]  ;;  %v313_v29 = vld [vmem:[%s1581_s30 + $0x10] sm:$0xff]  ;;  %v314_v31 = vld [vmem:[%s1581_s30 + $0x18] sm:$0xff]  ;;  %p740_p0 = scmp.ne.s32.totalorder %s1811_s4, 1 }
  0x98   : > { %v320_v28 = vld [vmem:[%s1581_s30 + $0x48] sm:$0xff]  ;;  %v321_v30 = vld [vmem:[%s1581_s30 + $0x50] sm:$0xff]  ;;  %v322_v32 = vld [vmem:[%s1581_s30 + $0x58] sm:$0xff] }
  0x99   : > { %846 = vmatpush3.bf16.msra.mxu0 %v843_v6  ;;  %880 = vmatpush3.bf16.msra.mxu1 %v843_v6  ;;  %v315_v33 = vld [vmem:[%s1581_s30 + $0x20] sm:$0xff]  ;;  %v316_v35 = vld [vmem:[%s1581_s30 + $0x28] sm:$0xff]  ;;  %v317_v37 = vld [vmem:[%s1581_s30 + $0x30] sm:$0xff] }
  0x9a   : > { %848 = vmatprep.subr.bf16.mxu0 %v847_v9  ;;  %873 = vmatprep.subr.bf16.mxu1 %v847_v9  ;;  %v323_v34 = vld [vmem:[%s1581_s30 + $0x60] sm:$0xff]  ;;  %v324_v36 = vld [vmem:[%s1581_s30 + $0x68] sm:$0xff]  ;;  %v325_v38 = vld [vmem:[%s1581_s30 + $0x70] sm:$0xff] }
  0x9b   : > { %v318_v39 = vld [vmem:[%s1581_s30 + $0x38] sm:$0xff]  ;;  %v296_v41 = vld [vmem:[#allocation2 + $0x8] sm:$0xff]  ;;  %v295_v43 = vld [vmem:[#allocation2] sm:$0xff] }
  0x9c   : > { %v326_v40 = vld [vmem:[%s1581_s30 + $0x78] sm:$0xff]  ;;  %v304_v42 = vld [vmem:[#allocation2 + $0x48] sm:$0xff]  ;;  %v303_v44 = vld [vmem:[#allocation2 + $0x40] sm:$0xff] }
  0x9d   : > { %850 = vmatpush3.bf16.msra.mxu0 %v847_v9  ;;  %881 = vmatpush3.bf16.msra.mxu1 %v847_v9  ;;  %v298_v53 = vld [vmem:[#allocation2 + $0x18] sm:$0xff]  ;;  %v297_v55 = vld [vmem:[#allocation2 + $0x10] sm:$0xff]  ;;  %v300_v1 = vld [vmem:[#allocation2 + $0x28] sm:$0xff] }
  0x9e   : > { %852 = vmatprep.subr.bf16.mxu0 %v851_v14  ;;  %874 = vmatprep.subr.bf16.mxu1 %v851_v14  ;;  %v306_v54 = vld [vmem:[#allocation2 + $0x58] sm:$0xff]  ;;  %v305_v56 = vld [vmem:[#allocation2 + $0x50] sm:$0xff]  ;;  %v308_v2 = vld [vmem:[#allocation2 + $0x68] sm:$0xff] }
  0x9f   : > { %v299_v3 = vld [vmem:[#allocation2 + $0x20] sm:$0xff]  ;;  %v302_v13 = vld [vmem:[#allocation2 + $0x38] sm:$0xff]  ;;  %v301_v15 = vld [vmem:[#allocation2 + $0x30] sm:$0xff] }
  0xa0   : > { %v307_v4 = vld [vmem:[#allocation2 + $0x60] sm:$0xff]  ;;  %v309_v16 = vld [vmem:[#allocation2 + $0x70] sm:$0xff] }
  0xa1   : > { %854 = vmatpush3.bf16.msra.mxu0 %v851_v14  ;;  %882 = vmatpush3.bf16.msra.mxu1 %v851_v14  ;;  %v310_v14 = vld [vmem:[#allocation2 + $0x78] sm:$0xff] }
  0xa2   : > { %856 = vmatprep.subr.bf16.mxu0 %v855_v17  ;;  %875 = vmatprep.subr.bf16.mxu1 %v855_v17 }
  0xa5   : > { %858 = vmatpush3.bf16.msra.mxu0 %v855_v17  ;;  %883 = vmatpush3.bf16.msra.mxu1 %v855_v17 }
  0xa6   : > { %860 = vmatprep.subr.bf16.mxu0 %v859_v20  ;;  %876 = vmatprep.subr.bf16.mxu1 %v859_v20 }
  0xa9   : > { %862 = vmatpush3.bf16.msra.mxu0 %v859_v20  ;;  %884 = vmatpush3.bf16.msra.mxu1 %v859_v20 }
  0xaa   : > { %864 = vmatprep.subr.bf16.mxu0 %v863_v23  ;;  %877 = vmatprep.subr.bf16.mxu1 %v863_v23 }
  0xad   : > { %866 = vmatpush3.bf16.msra.mxu0 %v863_v23  ;;  %885 = vmatpush3.bf16.msra.mxu1 %v863_v23 }
  0xae   : > { %868 = vmatprep.subr.bf16.mxu0 %v867_v26  ;;  %878 = vmatprep.subr.bf16.mxu1 %v867_v26 }
  0xb1   : > { %870 = vmatpush3.bf16.msra.mxu0 %v867_v26  ;;  %886 = vmatpush3.bf16.msra.mxu1 %v867_v26  ;;  %v741_v26 = vld [vmem:[%s273_s1] ss:$0 sm:$0xff] (!%p740_p0) }
  0xb4   : > { %816 = vmatmul.mubr.f32.vlgmr.msra.gmra.mrb[0].mxu0 %v312_v27  ;;  %828 = vmatmul.mubr.f32.vlgmr.msra.gmra.mrb[0].mxu1 %v320_v28 }
  0xb5   : > { %818 = vmatprep.mubr.f32.mxu0 %v313_v29  ;;  %830 = vmatprep.mubr.f32.mxu1 %v321_v30 }
  0xb8   : > { %819 = vmatmul.mubr.f32.gmra.mrb[2].mxu0 %v314_v31  ;;  %831 = vmatmul.mubr.f32.gmra.mrb[2].mxu1 %v322_v32 }
  0xb9   : > { %821 = vmatprep.mubr.f32.mxu0 %v315_v33  ;;  %833 = vmatprep.mubr.f32.mxu1 %v323_v34 }
  0xbc   : > { %822 = vmatmul.mubr.f32.gmra.mrb[4].mxu0 %v316_v35  ;;  %834 = vmatmul.mubr.f32.gmra.mrb[4].mxu1 %v324_v36 }
  0xbd   : > { %824 = vmatprep.mubr.f32.mxu0 %v317_v37  ;;  %836 = vmatprep.mubr.f32.mxu1 %v325_v38 }
  0xc0   : > { %825 = vmatmul.mubr.f32.gmra.mrb[6].mxu0 %v318_v39  ;;  %837 = vmatmul.mubr.f32.gmra.mrb[6].mxu1 %v326_v40 }
 0x187   : > { %v817_v45 = vpop.f32.mrb[0].mxu0  ;;  %v829_v46 = vpop.f32.mrb[0].mxu1 }
 0x188   : > { %v489_v47 = vadd.f32 %v817_v45, %v296_v41  ;;  %v497_v48 = vadd.f32 %v829_v46, %v304_v42  ;;  %v409_v49 = vpop.f32.mrb[1].mxu0  ;;  %v449_v50 = vpop.f32.mrb[1].mxu1 }
 0x189   : > { %v488_v51 = vadd.f32 %v409_v49, %v295_v43  ;;  %v496_v52 = vadd.f32 %v449_v50, %v303_v44 }
 0x18a   : > { %505 = vst [vmem:[#allocation2 + $0x8] sm:$0xff] %v489_v47  ;;  %513 = vst [vmem:[#allocation2 + $0x48] sm:$0xff] %v497_v48 }
 0x18b   : > { %504 = vst [vmem:[#allocation2] sm:$0xff] %v488_v51  ;;  %512 = vst [vmem:[#allocation2 + $0x40] sm:$0xff] %v496_v52  ;;  %v820_v57 = vpop.f32.mrb[2].mxu0  ;;  %v832_v58 = vpop.f32.mrb[2].mxu1 }
 0x18c   : > { %v491_v59 = vadd.f32 %v820_v57, %v298_v53  ;;  %v499_v60 = vadd.f32 %v832_v58, %v306_v54  ;;  %v419_v61 = vpop.f32.mrb[3].mxu0  ;;  %v459_v62 = vpop.f32.mrb[3].mxu1 }
 0x18d   : > { %v490_v63 = vadd.f32 %v419_v61, %v297_v55  ;;  %v498_v0 = vadd.f32 %v459_v62, %v305_v56 }
 0x18e   : > { %507 = vst [vmem:[#allocation2 + $0x18] sm:$0xff] %v491_v59  ;;  %515 = vst [vmem:[#allocation2 + $0x58] sm:$0xff] %v499_v60 }
 0x18f   : > { %506 = vst [vmem:[#allocation2 + $0x10] sm:$0xff] %v490_v63  ;;  %514 = vst [vmem:[#allocation2 + $0x50] sm:$0xff] %v498_v0  ;;  %v823_v5 = vpop.f32.mrb[4].mxu0  ;;  %v835_v6 = vpop.f32.mrb[4].mxu1 }
 0x190   : > { %v493_v7 = vadd.f32 %v823_v5, %v300_v1  ;;  %v501_v8 = vadd.f32 %v835_v6, %v308_v2  ;;  %v429_v9 = vpop.f32.mrb[5].mxu0  ;;  %v469_v10 = vpop.f32.mrb[5].mxu1 }
 0x191   : > { %v492_v11 = vadd.f32 %v429_v9, %v299_v3  ;;  %v500_v12 = vadd.f32 %v469_v10, %v307_v4  ;;  %523 = sbr.rel (%p740_p0) target bundleno = 419 (0x1a3), region = 48  ;;  %v525_v27 = vld [vmem:[#allocation2 + $0x8] sm:$0xff] (!%p740_p0) }
 0x192   : > { %509 = vst [vmem:[#allocation2 + $0x28] sm:$0xff] %v493_v7  ;;  %517 = vst [vmem:[#allocation2 + $0x68] sm:$0xff] %v501_v8  ;;  %v524_v25 = vld [vmem:[#allocation2] sm:$0xff] (!%p740_p0)  ;;  %v548_v29 = vadd.f32 (!%p740_p0), %v741_v26, %v525_v27  ;;  %v533_v43 = vld [vmem:[#allocation2 + $0x48] sm:$0xff] (!%p740_p0) }
 0x193   : > { %508 = vst [vmem:[#allocation2 + $0x20] sm:$0xff] %v492_v11  ;;  %516 = vst [vmem:[#allocation2 + $0x60] sm:$0xff] %v500_v12  ;;  %v826_v17 = vpop.f32.mrb[6].mxu0  ;;  %v838_v18 = vpop.f32.mrb[6].mxu1  ;;  %v547_v28 = vadd.f32 (!%p740_p0), %v741_v26, %v524_v25  ;;  %v532_v42 = vld [vmem:[#allocation2 + $0x40] sm:$0xff] (!%p740_p0)  ;;  %v556_v46 = vadd.f32 (!%p740_p0), %v741_v26, %v533_v43 }
 0x194   : > { %v495_v19 = vadd.f32 %v826_v17, %v302_v13  ;;  %v503_v20 = vadd.f32 %v838_v18, %v310_v14  ;;  %v439_v21 = vpop.f32.mrb[7].mxu0  ;;  %v479_v22 = vpop.f32.mrb[7].mxu1  ;;  %564 = vst [vmem:[%s1605_s21 + $0x8] sm:$0xff] (!%p740_p0), %v548_v29  ;;  %v555_v45 = vadd.f32 (!%p740_p0), %v741_v26, %v532_v42 }
 0x195   : > { %v494_v23 = vadd.f32 %v439_v21, %v301_v15  ;;  %v502_v24 = vadd.f32 %v479_v22, %v309_v16  ;;  %v527_v31 = vld [vmem:[#allocation2 + $0x18] sm:$0xff] (!%p740_p0)  ;;  %563 = vst [vmem:[%s1605_s21] sm:$0xff] (!%p740_p0), %v547_v28  ;;  %572 = vst [vmem:[%s1605_s21 + $0x48] sm:$0xff] (!%p740_p0), %v556_v46 }
 0x196   : > { %511 = vst [vmem:[#allocation2 + $0x38] sm:$0xff] %v495_v19  ;;  %519 = vst [vmem:[#allocation2 + $0x78] sm:$0xff] %v503_v20  ;;  %v526_v30 = vld [vmem:[#allocation2 + $0x10] sm:$0xff] (!%p740_p0)  ;;  %v550_v34 = vadd.f32 (!%p740_p0), %v741_v26, %v527_v31  ;;  %v535_v48 = vld [vmem:[#allocation2 + $0x58] sm:$0xff] (!%p740_p0) }
 0x197   : > { %510 = vst [vmem:[#allocation2 + $0x30] sm:$0xff] %v494_v23  ;;  %518 = vst [vmem:[#allocation2 + $0x70] sm:$0xff] %v502_v24  ;;  %v549_v33 = vadd.f32 (!%p740_p0), %v741_v26, %v526_v30  ;;  %v534_v44 = vld [vmem:[#allocation2 + $0x50] sm:$0xff] (!%p740_p0)  ;;  %v558_v51 = vadd.f32 (!%p740_p0), %v741_v26, %v535_v48 }
 0x198   : > { %566 = vst [vmem:[%s1605_s21 + $0x18] sm:$0xff] %v550_v34  ;;  %v557_v47 = vadd.f32 %v741_v26, %v534_v44  ;;  %571 = vst [vmem:[%s1605_s21 + $0x40] sm:$0xff] %v555_v45 }
 0x199   : > { %v529_v36 = vld [vmem:[#allocation2 + $0x28] sm:$0xff]  ;;  %565 = vst [vmem:[%s1605_s21 + $0x10] sm:$0xff] %v549_v33  ;;  %574 = vst [vmem:[%s1605_s21 + $0x58] sm:$0xff] %v558_v51 }
 0x19a   : > { %v528_v32 = vld [vmem:[#allocation2 + $0x20] sm:$0xff]  ;;  %v552_v39 = vadd.f32 %v741_v26, %v529_v36  ;;  %v537_v50 = vld [vmem:[#allocation2 + $0x68] sm:$0xff]  ;;  %573 = vst [vmem:[%s1605_s21 + $0x50] sm:$0xff] %v557_v47 }
 0x19b   : > { %v551_v35 = vadd.f32 %v741_v26, %v528_v32  ;;  %v536_v49 = vld [vmem:[#allocation2 + $0x60] sm:$0xff]  ;;  %v560_v53 = vadd.f32 %v741_v26, %v537_v50 }
 0x19c   : > { %568 = vst [vmem:[%s1605_s21 + $0x28] sm:$0xff] %v552_v39  ;;  %v559_v52 = vadd.f32 %v741_v26, %v536_v49 }
 0x19d   : > { %v531_v38 = vld [vmem:[#allocation2 + $0x38] sm:$0xff]  ;;  %567 = vst [vmem:[%s1605_s21 + $0x20] sm:$0xff] %v551_v35  ;;  %576 = vst [vmem:[%s1605_s21 + $0x68] sm:$0xff] %v560_v53 }
 0x19e   : > { %v530_v37 = vld [vmem:[#allocation2 + $0x30] sm:$0xff]  ;;  %v554_v41 = vadd.f32 %v741_v26, %v531_v38  ;;  %v539_v55 = vld [vmem:[#allocation2 + $0x78] sm:$0xff]  ;;  %575 = vst [vmem:[%s1605_s21 + $0x60] sm:$0xff] %v559_v52 }
 0x19f   : > { %v553_v40 = vadd.f32 %v741_v26, %v530_v37  ;;  %v538_v54 = vld [vmem:[#allocation2 + $0x70] sm:$0xff]  ;;  %v562_v57 = vadd.f32 %v741_v26, %v539_v55 }
 0x1a0   : > { %570 = vst [vmem:[%s1605_s21 + $0x38] sm:$0xff] %v554_v41  ;;  %v561_v56 = vadd.f32 %v741_v26, %v538_v54 }
 0x1a1   : > { %569 = vst [vmem:[%s1605_s21 + $0x30] sm:$0xff] %v553_v40  ;;  %578 = vst [vmem:[%s1605_s21 + $0x78] sm:$0xff] %v562_v57 }
 0x1a2   : > { %577 = vst [vmem:[%s1605_s21 + $0x70] sm:$0xff] %v561_v56 }
 0x1a3 PF: > { %s1812_s30 = sld [smem:[#allocation13_spill]]  ;;  %s1813_s5 = sld [smem:[#allocation17_spill]] }
 0x1a4   : > { %s595_s8 = sshll.u32 %s1605_s21, 4  ;;  %s1814_s1 = sld [smem:[#allocation21_spill]]  ;;  %s1665_s8 = int_to_ptr.vmem [resolvable:$true] %s595_s8 }
 0x1a5   : > { %s1674_s4 = scalar_lea.sflag [#allocation5], %s266_s28  ;;  %s1101_s29 = scalar_lea.vmem %s1665_s8, 2048 }
 0x1a6   : > { %p1102_p13 = scmp.ne.s32.totalorder %s1665_s8, %s1101_s29 }
 0x1a9   : > { %s750_s0 = sshll.u32 %s1812_s30, 5  ;;  %p1815_p2 = scmp.ne.s32.totalorder %s1813_s5, 0 }
 0x1aa   : > { %s592_s15 = sadd.s32 %s1247_s22, %s750_s0  ;;  %s1275_s22 = smov [#allocation8]  }
 0x1ab   : > { %s745_s9 = sshll.u32 %s592_s15, 7  ;;  %p1103_p10 = pnand %p1102_p13, %p1815_p2 }
 0x1ac   : > { %s1670_s26 = scalar_lea.hbm %s1814_s1, %s745_s9  ;;  %s1105_s21 = sshll.u32 %s1275_s22, 4  ;;  %s1106_s21 = int_to_ptr.vmem [resolvable:$false] %s1105_s21 }
 0x1ad   : > { %p1104_p12 = pneg %p1103_p10  ;;  %s1107_s3 = scalar_lea.vmem %s1106_s21, 4096 }
 0x1ae   : > { %p1108_p11 = scmp.lt.s32.totalorder %s1665_s8, %s1106_s21  ;;  %p1109_p3 = scmp.lt.s32.totalorder %s1107_s3, %s1101_s29 }
 0x1b0   : > { %p1110_p4 = por %p1109_p3, %p1108_p11 }
 0x1b2   : > { %p1111_p8 = pnand %p1110_p4, %p1104_p12 }
 0x1b4   : > { %1114 = shalt.err (!%p1111_p8)
}
 0x1b5   : > { %s1115_s28 = scalar_lea.hbm %s1670_s26, 2048  ;;  %s1119_s15 = scalar_lea.hbm %s1814_s1, 8192 }
 0x1b6   : > { %p1116_p6 = scmp.ne.s32.totalorder %s1670_s26, %s1115_s28  ;;  %p1120_p1 = scmp.lt.u32.totalorder %s1670_s26, %s1814_s1 }
 0x1b7   : > { %p1121_p5 = scmp.lt.u32.totalorder %s1119_s15, %s1115_s28  ;;  %p1123_p13 = scmp.lt.u32.totalorder %s1115_s28, %s1670_s26 }
 0x1b8   : > { %p1117_p9 = pnand %p1116_p6, %p1815_p2 }
 0x1b9   : > { %p1122_p0 = por %p1121_p5, %p1120_p1 }
 0x1ba   : > { %p1118_p7 = pneg %p1117_p9 }
 0x1bb   : > { %p1124_p10 = por %p1123_p13, %p1122_p0 }
 0x1bd   : > { %p1125_p12 = pnand %p1124_p10, %p1118_p7 }
 0x1bf   : > { %1128 = shalt.err (!%p1125_p12)
}
 0x1c0   : > { %s1276_s18 = smov 128   ;;  %s1277_s29 = smov 256  }
 0x1c1   : > { %s1278_s22 = smov 8  }
 0x1c2   : > { %891 = dma.vmem_to_hbm [thread:$0]  (%p1815_p2), %s1665_s8, 2048, %s1670_s26, %s1674_s4, %s1276_s18, %s1277_s29, %s1278_s22  }
 0x1c3 PF: > { %p905_p11 = scmp.ge.s32.totalorder %s1267_s27, 2  ;;  %s610_s21 = sand.u32 1, %s1207_s12  }
 0x1c4   : > { %p1816_p3 = scmp.ne.s32.totalorder %s1801_s23, 0  ;;  %s611_s3 = scalar_lea.sflag [#allocation5], %s610_s21 }
 0x1c6   : > { %p901_p4 = pnand %p905_p11, %p1816_p3 }
 0x1c8   : > { %1202 = dma.done.wait (!%p901_p4), %s611_s3, 2048  }
 0x1c9   : > { %1204 = vsyncadd (!%p901_p4), %s611_s3, 4294965248  ;;  %s22_s27 = sadd.s32 1, %s1267_s27   ;;  %s1818_s23 = sld [smem:[#allocation14_spill]] }
 0x1ca   : > { %p1703_p8 = scmp.ge.s32.totalorder %s22_s27, 10   ;;  %s1819_s5 = sld [smem:[#allocation15_spill]] }
 0x1cb   : > { %s1820_s8 = sld [smem:[#allocation16_spill]]  ;;  %s1821_s26 = sld [smem:[#allocation18_spill]] }
 0x1cc   : > { %s1822_s12 = smov %s1211_s13  ;;  %s1823_s13 = smov %s1215_s14 }
 0x1cd   : > { %s1824_s14 = smov %s1521_s6  ;;  %s1825_s15 = smov %s1223_s16 }
 0x1ce   : > { %s1826_s16 = smov %s1227_s17  ;;  %s1827_s17 = smov %s1507_s10 }
 0x1cf   : > { %s1828_s18 = smov %s1235_s19  ;;  %s1829_s19 = smov %s1239_s20 }
 0x1d0   : > { %s1830_s20 = smov %s1518_s11  ;;  %s1831_s21 = smov %s1255_s24 }
 0x1d1   : > { %s1832_s22 = smov %s1259_s25  ;;  %s1833_s24 = smov %s1819_s5 }
 0x1d2   : > { %s1834_s25 = smov %s1820_s8  ;;  %21 = sbr.rel (!%p1703_p8) target bundleno = 17 (0x11), region = 101 }
 0x1d9   :  { %616 = vsyncpa [#allocation4], 1 }
 0x1da   :  { %618 = vsyncpa [#allocation4 + $0x1], 1 }
 0x1db   :  { %619 = vsyncpa [#allocation7], 1 }
 0x1dc   :  { %621 = vsyncpa [#allocation7 + $0x1], 1 }
 0x1dd   :  { %622 = vsyncpa [#allocation5], 1 }
 0x1de   :  { %624 = vsyncpa [#allocation5 + $0x1], 1 }

</bundles_post_ra>
